<compile_context>
chip_gen: v7x
topology: tpu7x:2x2x1
jax: 0.10.0
libtpu: 0.0.40
codegen_flags: <defaults>
</compile_context>

<pallas_src>
from collections import OrderedDict

import jax
import jax.numpy as jnp
from jax.experimental import pallas as pl
from jax.experimental.pallas import tpu as pltpu


def _round_up(x, m):
    return (x + m - 1) // m * m


# ---------------------------------------------------------------------------
# Pallas kernel: fused 2-layer MLP + relu + concatenated tanh heads
# ---------------------------------------------------------------------------
def _inverse_model_kernel(x_ref, w1_ref, b1_ref, w2_ref, b2_ref,
                          wh_ref, bh_ref, out_ref):
    x = x_ref[...]                                                      # bf16 (tile, D_in)

    # MLP hidden layer: Linear + relu  (config.policy_activation == "relu")
    h = jnp.dot(x, w1_ref[...], preferred_element_type=jnp.float32) + b1_ref[...]
    h = jnp.maximum(h, 0.0)                                             # f32

    # MLP output layer (no activation inside MLP), then outer activation_fn (relu)
    h = jnp.dot(h.astype(jnp.bfloat16), w2_ref[...],
                preferred_element_type=jnp.float32) + b2_ref[...]
    h = jnp.maximum(h, 0.0)

    # concatenated action heads (lane-padded to 128) + tanh
    a = jnp.dot(h.astype(jnp.bfloat16), wh_ref[...],
                preferred_element_type=jnp.float32) + bh_ref[...]
    out_ref[...] = jnp.tanh(a)                                          # f32 (tile, A_pad)


# ---------------------------------------------------------------------------
# Wrapper: dict flatten/concat, padding, pallas_call, per-key head split
# ---------------------------------------------------------------------------
def inverse_model_forward(ob, ob_next, params, ac_dims, *, batch_tile=256):
    """ob / ob_next: OrderedDict[str, (B, d_k) or (d_k,) arrays]. Returns OrderedDict of tanh actions."""
    # ------- plain-JAX glue: dict flatten / concat -------
    ob_list = list(ob.values())
    if ob_list[0].ndim == 1:
        ob_list = [x[None, :] for x in ob_list]
    ob_cat = jnp.concatenate(ob_list, axis=-1)

    obn_list = list(ob_next.values())
    if obn_list[0].ndim == 1:
        obn_list = [x[None, :] for x in obn_list]
    obn_cat = jnp.concatenate(obn_list, axis=-1)

    s_sn = jnp.concatenate([ob_cat, obn_cat], axis=-1)                  # (B, 2*ob_dim), f32
    B, D_in = s_sn.shape

    w1, b1, w2, b2, wh, bh = (params["w1"], params["b1"], params["w2"],
                              params["b2"], params["wh"], params["bh"])
    H = w1.shape[1]
    A = wh.shape[1]                                                     # sum of all action dims

    # ------- tiling / padding -------
    tile = _round_up(min(batch_tile, B), 8)        # sublane multiple; whole batch if small
    B_pad = _round_up(B, tile)
    if B_pad != B:
        s_sn = jnp.pad(s_sn, ((0, B_pad - B), (0, 0)))

    A_pad = _round_up(A, 128)                      # lane-dense output store
    if A_pad != A:
        wh = jnp.pad(wh, ((0, 0), (0, A_pad - A)))
        bh = jnp.pad(bh, ((0, 0), (0, A_pad - A)))

    # bf16 matmul operands (MXU-native on v5e/v6e/v7x); biases & elementwise stay f32
    x_bf = s_sn.astype(jnp.bfloat16)
    w1_bf = w1.astype(jnp.bfloat16)
    w2_bf = w2.astype(jnp.bfloat16)
    wh_bf = wh.astype(jnp.bfloat16)
    b1_f = b1.astype(jnp.float32)
    b2_f = b2.astype(jnp.float32)
    bh_f = bh.astype(jnp.float32)

    grid = (B_pad // tile,)

    cost = pl.CostEstimate(
        flops=2 * B_pad * (D_in * H + H * H + H * A_pad),
        transcendentals=B_pad * A_pad,
        bytes_accessed=(B_pad * D_in * 2
                        + (D_in * H + H * H + H * A_pad) * 2
                        + (2 * H + A_pad) * 4
                        + B_pad * A_pad * 4),
    )

    out = pl.pallas_call(
        _inverse_model_kernel,
        out_shape=jax.ShapeDtypeStruct((B_pad, A_pad), jnp.float32),
        grid_spec=pltpu.PrefetchScalarGridSpec(
            num_scalar_prefetch=0,
            grid=grid,
            in_specs=[
                pl.BlockSpec((tile, D_in), lambda i: (i, 0)),   # x
                pl.BlockSpec((D_in, H),    lambda i: (0, 0)),   # w1 (resident)
                pl.BlockSpec((1, H),       lambda i: (0, 0)),   # b1
                pl.BlockSpec((H, H),       lambda i: (0, 0)),   # w2
                pl.BlockSpec((1, H),       lambda i: (0, 0)),   # b2
                pl.BlockSpec((H, A_pad),   lambda i: (0, 0)),   # wh (lane-padded)
                pl.BlockSpec((1, A_pad),   lambda i: (0, 0)),   # bh
            ],
            out_specs=pl.BlockSpec((tile, A_pad), lambda i: (i, 0)),
        ),
        compiler_params=pltpu.CompilerParams(
            dimension_semantics=("parallel",)),
        cost_estimate=cost,
    )(x_bf, w1_bf, b1_f, w2_bf, b2_f, wh_bf, bh_f)

    out = out[:B, :A]                              # drop batch + lane padding

    # ------- plain-JAX glue: split concatenated heads per action key -------
    acs = OrderedDict()
    off = 0
    for k, d in ac_dims.items():
        acs[k] = out[:, off:off + d]
        off += d
    return acs


# ---------------------------------------------------------------------------
# Pure-JAX reference (mirrors the kernel's bf16-operand / f32-accumulate math)
# ---------------------------------------------------------------------------
def _reference(ob, ob_next, params, ac_dims):
    ob_list = [x[None, :] if x.ndim == 1 else x for x in ob.values()]
    obn_list = [x[None, :] if x.ndim == 1 else x for x in ob_next.values()]
    s_sn = jnp.concatenate([jnp.concatenate(ob_list, -1),
                            jnp.concatenate(obn_list, -1)], -1)
    x = s_sn.astype(jnp.bfloat16)
    w1 = params["w1"].astype(jnp.bfloat16)
    w2 = params["w2"].astype(jnp.bfloat16)
    wh = params["wh"].astype(jnp.bfloat16)

    h = jnp.dot(x, w1, preferred_element_type=jnp.float32) + params["b1"]
    h = jnp.maximum(h, 0.0)
    h = jnp.dot(h.astype(jnp.bfloat16), w2,
                preferred_element_type=jnp.float32) + params["b2"]
    h = jnp.maximum(h, 0.0)
    a = jnp.tanh(jnp.dot(h.astype(jnp.bfloat16), wh,
                         preferred_element_type=jnp.float32) + params["bh"])

    acs = OrderedDict()
    off = 0
    for k, d in ac_dims.items():
        acs[k] = a[:, off:off + d]
        off += d
    return acs


if __name__ == "__main__":
    key = jax.random.PRNGKey(0)

    # synthetic spaces: ob_space = {"robot_ob": 6, "object_ob": 10}  -> ob_dim = 16
    #                   ac_space = {"right_arm": 7, "gripper": 1}
    # config.inverse_model_mlp_dim = [32, 32]  (hidden=[32], output=32)
    ob_dims = OrderedDict([("robot_ob", 6), ("object_ob", 10)])
    ac_dims = OrderedDict([("right_arm", 7), ("gripper", 1)])
    D_in = 2 * sum(ob_dims.values())          # 32
    H = 32
    A = sum(ac_dims.values())                 # 8

    keys = jax.random.split(key, 12)

    # deterministic synthetic parameters (not a checkpoint)
    params = {
        "w1": jax.random.normal(keys[4], (D_in, H), jnp.float32) * 0.1,
        "b1": jax.random.normal(keys[5], (1, H), jnp.float32) * 0.01,
        "w2": jax.random.normal(keys[6], (H, H), jnp.float32) * 0.1,
        "b2": jax.random.normal(keys[7], (1, H), jnp.float32) * 0.01,
        "wh": jax.random.normal(keys[8], (H, A), jnp.float32) * 0.1,
        "bh": jax.random.normal(keys[9], (1, A), jnp.float32) * 0.01,
    }

    def make_obs(B, kofs):
        ob = OrderedDict(
            (k, jax.random.normal(keys[kofs + i], (B, d), jnp.float32))
            for i, (k, d) in enumerate(ob_dims.items()))
        ob_next = OrderedDict(
            (k, jax.random.normal(keys[kofs + 2 + i], (B, d), jnp.float32))
            for i, (k, d) in enumerate(ob_dims.items()))
        return ob, ob_next

    # --- case 1: small batch, single grid step (whole batch in one tile) ---
    B1 = 8
    ob, ob_next = make_obs(B1, 0)
    acs = inverse_model_forward(ob, ob_next, params, ac_dims)
    acs = jax.tree_util.tree_map(jax.block_until_ready, acs)
    ref = _reference(ob, ob_next, params, ac_dims)
    for k in ac_dims:
        assert acs[k].shape == (B1, ac_dims[k])
        assert jnp.allclose(acs[k], ref[k], atol=1e-3, rtol=1e-3), f"mismatch on {k}"

    # --- case 2: ragged batch + multi-step grid (exercises padding path) ---
    B2 = 20
    ob2, ob_next2 = make_obs(B2, 0)
    acs2 = inverse_model_forward(ob2, ob_next2, params, ac_dims, batch_tile=16)
    acs2 = jax.tree_util.tree_map(jax.block_until_ready, acs2)
    ref2 = _reference(ob2, ob_next2, params, ac_dims)
    for k in ac_dims:
        assert acs2[k].shape == (B2, ac_dims[k])
        assert jnp.allclose(acs2[k], ref2[k], atol=1e-3, rtol=1e-3), f"mismatch on {k}"

    print("KERNEL_OK")
</pallas_src>

<mosaic_0001>
module attributes {stable_mosaic.version = 11 : i64} {
  func.func @_inverse_model_kernel(%arg0: i32, %arg1: memref<8x32xbf16, #tpu.memory_space<vmem>>, %arg2: memref<32x32xbf16, #tpu.memory_space<vmem>>, %arg3: memref<1x32xf32, #tpu.memory_space<vmem>>, %arg4: memref<32x32xbf16, #tpu.memory_space<vmem>>, %arg5: memref<1x32xf32, #tpu.memory_space<vmem>>, %arg6: memref<32x128xbf16, #tpu.memory_space<vmem>>, %arg7: memref<1x128xf32, #tpu.memory_space<vmem>>, %arg8: memref<8x128xf32, #tpu.memory_space<vmem>>) attributes {dimension_semantics = [#tpu.dimension_semantics<parallel>], iteration_bounds = array<i64: 1>, scalar_prefetch = 0 : i64, scratch_operands = 0 : i64, tpu.core_type = #tpu.core_type<tc>, window_params = [{transform_indices = @transform_0, window_bounds = array<i64: 8, 32>}, {pipeline_mode = #tpu.pipeline_mode<synchronous>, transform_indices = @transform_1, window_bounds = array<i64: 32, 32>}, {pipeline_mode = #tpu.pipeline_mode<synchronous>, transform_indices = @transform_2, window_bounds = array<i64: 1, 32>}, {pipeline_mode = #tpu.pipeline_mode<synchronous>, transform_indices = @transform_3, window_bounds = array<i64: 32, 32>}, {pipeline_mode = #tpu.pipeline_mode<synchronous>, transform_indices = @transform_4, window_bounds = array<i64: 1, 32>}, {pipeline_mode = #tpu.pipeline_mode<synchronous>, transform_indices = @transform_5, window_bounds = array<i64: 32, 128>}, {pipeline_mode = #tpu.pipeline_mode<synchronous>, transform_indices = @transform_6, window_bounds = array<i64: 1, 128>}, {transform_indices = @transform_7, window_bounds = array<i64: 8, 128>}]} {
    %c0 = arith.constant 0 : index
    %c0_0 = arith.constant 0 : index
    %0 = vector.load %arg1[%c0, %c0_0] : memref<8x32xbf16, #tpu.memory_space<vmem>>, vector<8x32xbf16>
    %c0_1 = arith.constant 0 : index
    %c0_2 = arith.constant 0 : index
    %1 = vector.load %arg2[%c0_1, %c0_2] : memref<32x32xbf16, #tpu.memory_space<vmem>>, vector<32x32xbf16>
    %cst = arith.constant dense<0.000000e+00> : vector<8x32xf32>
    %2 = tpu.matmul %0, %1, %cst {dimension_numbers = #tpu.dot_dimension_numbers<[1], [0], [0], [1], [0, 0, 1, 1], [], []>} : vector<8x32xbf16>, vector<32x32xbf16>, vector<8x32xf32> -> vector<8x32xf32>
    %c0_3 = arith.constant 0 : index
    %c0_4 = arith.constant 0 : index
    %3 = vector.load %arg3[%c0_3, %c0_4] : memref<1x32xf32, #tpu.memory_space<vmem>>, vector<1x32xf32>
    %4 = vector.broadcast %3 : vector<1x32xf32> to vector<8x32xf32>
    %5 = arith.addf %2, %4 : vector<8x32xf32>
    %cst_5 = arith.constant 0.000000e+00 : f32
    %6 = vector.broadcast %cst_5 : f32 to vector<8x32xf32>
    %7 = arith.maximumf %5, %6 : vector<8x32xf32>
    %8 = arith.truncf %7 : vector<8x32xf32> to vector<8x32xbf16>
    %c0_6 = arith.constant 0 : index
    %c0_7 = arith.constant 0 : index
    %9 = vector.load %arg4[%c0_6, %c0_7] : memref<32x32xbf16, #tpu.memory_space<vmem>>, vector<32x32xbf16>
    %cst_8 = arith.constant dense<0.000000e+00> : vector<8x32xf32>
    %10 = tpu.matmul %8, %9, %cst_8 {dimension_numbers = #tpu.dot_dimension_numbers<[1], [0], [0], [1], [0, 0, 1, 1], [], []>} : vector<8x32xbf16>, vector<32x32xbf16>, vector<8x32xf32> -> vector<8x32xf32>
    %c0_9 = arith.constant 0 : index
    %c0_10 = arith.constant 0 : index
    %11 = vector.load %arg5[%c0_9, %c0_10] : memref<1x32xf32, #tpu.memory_space<vmem>>, vector<1x32xf32>
    %12 = vector.broadcast %11 : vector<1x32xf32> to vector<8x32xf32>
    %13 = arith.addf %10, %12 : vector<8x32xf32>
    %cst_11 = arith.constant 0.000000e+00 : f32
    %14 = vector.broadcast %cst_11 : f32 to vector<8x32xf32>
    %15 = arith.maximumf %13, %14 : vector<8x32xf32>
    %16 = arith.truncf %15 : vector<8x32xf32> to vector<8x32xbf16>
    %c0_12 = arith.constant 0 : index
    %c0_13 = arith.constant 0 : index
    %17 = vector.load %arg6[%c0_12, %c0_13] : memref<32x128xbf16, #tpu.memory_space<vmem>>, vector<32x128xbf16>
    %cst_14 = arith.constant dense<0.000000e+00> : vector<8x128xf32>
    %18 = tpu.matmul %16, %17, %cst_14 {dimension_numbers = #tpu.dot_dimension_numbers<[1], [0], [0], [1], [0, 0, 1, 1], [], []>} : vector<8x32xbf16>, vector<32x128xbf16>, vector<8x128xf32> -> vector<8x128xf32>
    %c0_15 = arith.constant 0 : index
    %c0_16 = arith.constant 0 : index
    %19 = vector.load %arg7[%c0_15, %c0_16] : memref<1x128xf32, #tpu.memory_space<vmem>>, vector<1x128xf32>
    %20 = vector.broadcast %19 : vector<1x128xf32> to vector<8x128xf32>
    %21 = arith.addf %18, %20 : vector<8x128xf32>
    %22 = math.tanh %21 : vector<8x128xf32>
    %c0_17 = arith.constant 0 : index
    %c0_18 = arith.constant 0 : index
    %23 = vector.load %arg8[%c0_17, %c0_18] : memref<8x128xf32, #tpu.memory_space<vmem>>, vector<8x128xf32>
    tpu.vector_store %arg8[%c0_17, %c0_18], %22 {strides = array<i32>} : memref<8x128xf32, #tpu.memory_space<vmem>>, vector<8x128xf32>,
    return
  }
  func.func @transform_0(%arg0: i32) -> (i32, i32) {
    %c0_i32 = arith.constant 0 : i32
    %c0_i32_0 = arith.constant 0 : i32
    return %arg0, %c0_i32 : i32, i32
  }
  func.func @transform_1(%arg0: i32) -> (i32, i32) {
    %c0_i32 = arith.constant 0 : i32
    %c0_i32_0 = arith.constant 0 : i32
    %c0_i32_1 = arith.constant 0 : i32
    return %c0_i32, %c0_i32_0 : i32, i32
  }
  func.func @transform_2(%arg0: i32) -> (i32, i32) {
    %c0_i32 = arith.constant 0 : i32
    %c0_i32_0 = arith.constant 0 : i32
    %c0_i32_1 = arith.constant 0 : i32
    return %c0_i32, %c0_i32_0 : i32, i32
  }
  func.func @transform_3(%arg0: i32) -> (i32, i32) {
    %c0_i32 = arith.constant 0 : i32
    %c0_i32_0 = arith.constant 0 : i32
    %c0_i32_1 = arith.constant 0 : i32
    return %c0_i32, %c0_i32_0 : i32, i32
  }
  func.func @transform_4(%arg0: i32) -> (i32, i32) {
    %c0_i32 = arith.constant 0 : i32
    %c0_i32_0 = arith.constant 0 : i32
    %c0_i32_1 = arith.constant 0 : i32
    return %c0_i32, %c0_i32_0 : i32, i32
  }
  func.func @transform_5(%arg0: i32) -> (i32, i32) {
    %c0_i32 = arith.constant 0 : i32
    %c0_i32_0 = arith.constant 0 : i32
    %c0_i32_1 = arith.constant 0 : i32
    return %c0_i32, %c0_i32_0 : i32, i32
  }
  func.func @transform_6(%arg0: i32) -> (i32, i32) {
    %c0_i32 = arith.constant 0 : i32
    %c0_i32_0 = arith.constant 0 : i32
    %c0_i32_1 = arith.constant 0 : i32
    return %c0_i32, %c0_i32_0 : i32, i32
  }
  func.func @transform_7(%arg0: i32) -> (i32, i32) {
    %c0_i32 = arith.constant 0 : i32
    %c0_i32_0 = arith.constant 0 : i32
    return %arg0, %c0_i32 : i32, i32
  }
}

</mosaic_0001>

<bundles_post_ra>
// kernel: tpu_custom_call.1
= control target key start
LH: loop header
LB: loop body
LE: loop exit
PB: predicated region body
PF: predicated region fallthrough
CT: control target
= control target key end

     0   :  { %12 = vsyncpa [#allocation3], 0  ;;  %s564_s0 = inlined_call_operand.hbm [shape: bf16[8,32], index: 0, kind: input, shape index: {}]   ;;  %s565_s1 = inlined_call_operand.hbm [shape: bf16[32,32], index: 1, kind: input, shape index: {}]   ;;  %s566_s2 = inlined_call_operand.vmem [shape: f32[1,32], index: 2, kind: input, shape index: {}]   ;;  %s567_s3 = inlined_call_operand.hbm [shape: bf16[32,32], index: 3, kind: input, shape index: {}]   ;;  %s568_s4 = inlined_call_operand.vmem [shape: f32[1,32], index: 4, kind: input, shape index: {}]   ;;  %s569_s5 = inlined_call_operand.vmem [shape: bf16[32,128], index: 5, kind: input, shape index: {}]   ;;  %s570_s6 = inlined_call_operand.vmem [shape: f32[1,128], index: 6, kind: input, shape index: {}]   ;;  %s571_s7 = inlined_call_operand.hbm [shape: f32[8,128], index: 7, kind: output, shape index: {}]  }
   0x1   :  { %13 = vsyncpa [#allocation6], 0 }
   0x2   :  { %14 = vsyncpa [#allocation4], 0  ;;  %s444_s24 = smov [#allocation5]   ;;  %s350_s28 = scalar_lea.hbm %s565_s1, 256 }
   0x3   :  { %s30_s25 = sshll.u32 %s444_s24, 4  ;;  %p351_p0 = scmp.ne.s32.totalorder %s565_s1, %s350_s28  ;;  %s31_s25 = int_to_ptr.vmem [resolvable:$true] %s30_s25 }
   0x4   :  { %p354_p1 = scmp.lt.u32.totalorder %s350_s28, %s565_s1 }
   0x6   :  { %p356_p2 = pnand %p354_p1, %p351_p0 }
   0x8   :  { %359 = shalt.err (!%p356_p2)
}
   0x9   :  { %s360_s10 = scalar_lea.vmem %s31_s25, 256  ;;  %p365_p4 = scmp.lt.s32.totalorder %s31_s25, %s31_s25 }
   0xa   :  { %p361_p3 = scmp.ne.s32.totalorder %s31_s25, %s360_s10  ;;  %p366_p5 = scmp.lt.s32.totalorder %s360_s10, %s360_s10 }
   0xc   :  { %p367_p6 = por %p366_p5, %p365_p4 }
   0xe   :  { %p368_p7 = pnand %p367_p6, %p361_p3 }
  0x10   :  { %371 = shalt.err (!%p368_p7)
}
  0x11   :  { %s445_s11 = smov 64   ;;  %s446_s12 = smov 4  }
  0x12   :  { %36 = dma.hbm_to_vmem [thread:$0]  %s565_s1, 256, %s31_s25, [#allocation6], %s445_s11, %s445_s11, %s446_s12  }
  0x13   :  { %s447_s15 = smov [#allocation2]   ;;  %s448_s17 = smov [#allocation7]  }
  0x14   :  { %s21_s16 = sshll.u32 %s447_s15, 4  ;;  %s44_s18 = sshll.u32 %s448_s17, 4  ;;  %s22_s16 = int_to_ptr.vmem [resolvable:$true] %s21_s16  ;;  %s45_s18 = int_to_ptr.vmem [resolvable:$true] %s44_s18 }
  0x15   :  { %s372_s21 = scalar_lea.hbm %s564_s0, 64 }
  0x16   :  { %p373_p8 = scmp.ne.s32.totalorder %s564_s0, %s372_s21  ;;  %p376_p9 = scmp.lt.u32.totalorder %s372_s21, %s564_s0 }
  0x18   :  { %p378_p10 = pnand %p376_p9, %p373_p8 }
  0x1a   :  { %381 = shalt.err (!%p378_p10)
}
  0x1b   :  { %s382_s1 = scalar_lea.vmem %s22_s16, 64  ;;  %p387_p12 = scmp.lt.s32.totalorder %s22_s16, %s22_s16 }
  0x1c   :  { %p383_p11 = scmp.ne.s32.totalorder %s22_s16, %s382_s1  ;;  %p388_p13 = scmp.lt.s32.totalorder %s382_s1, %s382_s1 }
  0x1e   :  { %p389_p0 = por %p388_p13, %p387_p12 }
  0x20   :  { %p390_p1 = pnand %p389_p0, %p383_p11 }
  0x22   :  { %393 = shalt.err (!%p390_p1)
}
  0x23   :  { %24 = dma.hbm_to_vmem [thread:$0]  %s564_s0, 64, %s22_s16, [#allocation3]  }
  0x24   :  { %s394_s30 = scalar_lea.hbm %s567_s3, 256 }
  0x25   :  { %p395_p2 = scmp.ne.s32.totalorder %s567_s3, %s394_s30  ;;  %p398_p3 = scmp.lt.u32.totalorder %s394_s30, %s567_s3 }
  0x27   :  { %p400_p4 = pnand %p398_p3, %p395_p2 }
  0x29   :  { %403 = shalt.err (!%p400_p4)
}
  0x2a   :  { %s404_s14 = scalar_lea.vmem %s45_s18, 256  ;;  %p409_p6 = scmp.lt.s32.totalorder %s45_s18, %s45_s18 }
  0x2b   :  { %p405_p5 = scmp.ne.s32.totalorder %s45_s18, %s404_s14  ;;  %p410_p7 = scmp.lt.s32.totalorder %s404_s14, %s404_s14 }
  0x2d   :  { %p411_p8 = por %p410_p7, %p409_p6 }
  0x2f   :  { %p412_p9 = pnand %p411_p8, %p405_p5 }
  0x31   :  { %415 = shalt.err (!%p412_p9)
}
  0x32   :  { %50 = dma.hbm_to_vmem [thread:$0]  %s567_s3, 256, %s45_s18, [#allocation6], %s445_s11, %s445_s11, %s446_s12  }
  0x33   :  { %438 = dma.done.wait [#allocation3], 64  }
  0x34   :  { %439 = vsyncadd [#allocation3], 4294967232 }
  0x35   :  { %440 = dma.done.wait [#allocation6], 512  }
  0x36   :  { %441 = vsyncadd [#allocation6], 4294966784  ;;  %v449_v0 = vmov 0.0   ;;  %vm450_vm0 = vmmov 0   ;;  %v342_v1 = vld [vmem:[#allocation5] sm:$0xff]   ;;  %v343_v2 = vld [vmem:[#allocation5 + $0x8] sm:$0xff]  }
  0x37   :  { %310 = vmatprep.subr.bf16.mxu0 %v449_v0  ;;  %314 = vmatprep.mubr.msk.bf16.mxu0 %vm450_vm0, %v449_v0  ;;  %v67_v3 = vld [vmem:[#allocation2] sm:$0xf]  ;;  %vm91_vm1 = vcmask 261120   ;;  %v344_v4 = vld [vmem:[#allocation7] sm:$0xff]   ;;  %v289_v7 = vld [vmem:[%s566_s2] ss:$0 sm:$0xff] }
  0x38   :  { %318 = vmatprep.subr.bf16.mxu1 %v449_v0  ;;  %322 = vmatprep.mubr.msk.bf16.mxu1 %vm450_vm0, %v449_v0  ;;  %v345_v5 = vld [vmem:[#allocation7 + $0x8] sm:$0xff]   ;;  %v346_v6 = vld [vmem:[%s569_s5] sm:$0xff]  }
  0x39   :  { %311 = vmatpush3.bf16.msra.mxu0 %v342_v1  ;;  %319 = vmatpush3.bf16.msra.mxu1 %v344_v4  ;;  %v347_v15 = vld [vmem:[%s569_s5 + $0x8] sm:$0xff]   ;;  %v293_v16 = vld [vmem:[%s568_s4] ss:$0 sm:$0xff]  ;;  %s451_s4 = smov [#allocation8]  }
  0x3a   :  { %312 = vmatprep.subr.bf16.mxu0 %v449_v0  ;;  %320 = vmatprep.subr.bf16.mxu1 %v449_v0  ;;  %v297_v24 = vld [vmem:[%s570_s6] ss:$0 sm:$0xff]  ;;  %s279_s5 = sshll.u32 %s451_s4, 4  ;;  %s280_s5 = int_to_ptr.vmem [resolvable:$true] %s279_s5 }
  0x3b   :  { %s416_s22 = scalar_lea.vmem %s280_s5, 128  ;;  %p421_p11 = scmp.lt.s32.totalorder %s280_s5, %s280_s5 }
  0x3c   :  { %p417_p10 = scmp.ne.s32.totalorder %s280_s5, %s416_s22  ;;  %p422_p12 = scmp.lt.s32.totalorder %s416_s22, %s416_s22 }
  0x3d   :  { %313 = vmatpush3.bf16.msra.mxu0 %v343_v2  ;;  %321 = vmatpush3.bf16.msra.mxu1 %v345_v5 }
  0x3e   :  { %326 = vmatprep.subr.bf16.mxu0 %v449_v0  ;;  %p423_p13 = por %p422_p12, %p421_p11 }
  0x40   :  { %315 = vmatmul.mubr.msk.bf16.vlgmr.msra.gmra.mrb[0].mxu0 %vm91_vm1, %v67_v3  ;;  %p424_p0 = pnand %p423_p13, %p417_p10 }
  0x41   :  { %330 = vmatprep.mubr.msk.bf16.mxu0 %vm450_vm0, %v449_v0  ;;  %327 = vmatpush3.bf16.msra.mxu0 %v346_v6 }
  0x42   :  { %328 = vmatprep.subr.bf16.mxu0 %v449_v0 }
  0x45   :  { %329 = vmatpush3.bf16.msra.mxu0 %v347_v15 }
 0x113   :  { %v129_v8 = vpop.f32.mrb[0].mxu0 }
 0x114   :  { %v130_v9 = vadd.f32 %v289_v7, %v129_v8  ;;  %v316_v10 = vpop.f32.mrb[1].mxu0 }
 0x115   :  { %v132_v11 = vpop.f32.mrb[2].mxu0 }
 0x116   :  { %v135_v12 = vmax.f32 %v130_v9, 0.0  ;;  %v317_v13 = vpop.f32.mrb[3].mxu0 }
 0x118   :  { %v136_v14 = vpack.c.bf16 %v135_v12, %v135_v12 }
 0x11a   :  { %323 = vmatmul.mubr.msk.bf16.vlgmr.msra.gmra.mrb[0].mxu1 %vm91_vm1, %v136_v14 }
 0x1ed   :  { %v197_v17 = vpop.f32.mrb[0].mxu1 }
 0x1ee   :  { %v198_v18 = vadd.f32 %v293_v16, %v197_v17  ;;  %v324_v19 = vpop.f32.mrb[1].mxu1 }
 0x1ef   :  { %v200_v20 = vpop.f32.mrb[2].mxu1 }
 0x1f0   :  { %v203_v21 = vmax.f32 %v198_v18, 0.0  ;;  %v325_v22 = vpop.f32.mrb[3].mxu1 }
 0x1f2   :  { %v204_v23 = vpack.c.bf16 %v203_v21, %v203_v21 }
 0x1f4   :  { %331 = vmatmul.mubr.msk.bf16.vlgmr.msra.gmra.mrb[4].mxu0 %vm91_vm1, %v204_v23 }
 0x2c7   :  { %v265_v25 = vpop.f32.mrb[4].mxu0 }
 0x2c8   :  { %v266_v26 = vadd.f32 %v297_v24, %v265_v25  ;;  %v332_v27 = vpop.f32.mrb[5].mxu0 }
 0x2c9   :  { %v268_v28 = vpop.f32.mrb[6].mxu0 }
 0x2ca   :  { %348 = vtanh.f32 %v266_v26  ;;  %v333_v29 = vpop.f32.mrb[7].mxu0 }
 0x2d4   :  { %v349_v30 = vpop.eup %348 }
 0x2d5   :  { %272 = vst [vmem:[#allocation8] sm:$0xff] %v349_v30 }
 0x2d6   :  { %427 = shalt.err (!%p424_p0)
}
 0x2d7   :  { %s428_s24 = scalar_lea.hbm %s571_s7, 128 }
 0x2d8   :  { %p429_p1 = scmp.ne.s32.totalorder %s571_s7, %s428_s24  ;;  %p432_p2 = scmp.lt.u32.totalorder %s428_s24, %s571_s7 }
 0x2da   :  { %p434_p3 = pnand %p432_p2, %p429_p1 }
 0x2dc   :  { %437 = shalt.err (!%p434_p3)
}
 0x2dd   :  { %282 = dma.vmem_to_hbm [thread:$0]  %s280_s5, 128, %s571_s7, [#allocation4]  }
 0x2de   :  { %442 = dma.done.wait [#allocation4], 128  }
 0x2df   :  { %443 = vsyncadd [#allocation4], 4294967168 }
 0x2e0   :  { %286 = vsyncpa [#allocation3], 1 }
 0x2e1   :  { %287 = vsyncpa [#allocation6], 1 }
 0x2e2   :  { %288 = vsyncpa [#allocation4], 1 }

</bundles_post_ra>
